<compile_context>
chip_gen: v5e
topology: v5e:2x2
jax: 0.10.0
libtpu: 0.0.40
codegen_flags: <defaults>
</compile_context>

<pallas_src>
import jax
import jax.numpy as jnp
from jax import lax
from jax.experimental import pallas as pl
from jax.experimental.pallas import tpu as pltpu

_LANE = 128


def _round_up(x, m):
    return (x + m - 1) // m * m


def _pad2d(a, rows, cols):
    return jnp.pad(a, ((0, rows - a.shape[0]), (0, cols - a.shape[1])))


def _row_normalize(s):
    # torch F.normalize(p=2, dim=1): s / max(||s||, 1e-12)
    #   ==  s * rsqrt(max(||s||^2, 1e-24))   (both args non-negative)
    nrm2 = jnp.sum(s * s, axis=1, keepdims=True)
    return s * lax.rsqrt(jnp.maximum(nrm2, 1e-24))


def _dhgcf1_fused_kernel(adj_ref, x_ref, w0_ref, b0_ref, w1_ref, b1_ref, o_ref):
    # adj_ref : (N, N)   f32  dense normalized adjacency
    # x_ref   : (N, Fp)  f32  input features, zero-padded to 128 lanes
    # w0_ref  : (Fp, Dp) f32  layer-0 weight (zero-padded)
    # b0_ref  : (1, Dp)  f32  layer-0 bias   (zero-padded)
    # w1_ref  : (Dp, Fp) f32  layer-1 weight (zero-padded)
    # b1_ref  : (1, Fp)  f32  layer-1 bias   (zero-padded)
    # o_ref   : (N, Fp)  f32  output (padded lanes stay zero)
    adj = adj_ref[...]

    # ---- layer 0:  A @ (X @ W0) + b0, row-L2-normalize ---------------------
    # (re-association is exact in real arithmetic; f32 operands keep the
    #  rounding difference vs. torch's (A@X)@W0 negligible)
    xw0 = jnp.dot(x_ref[...], w0_ref[...], preferred_element_type=jnp.float32)
    s0 = jnp.dot(adj, xw0, preferred_element_type=jnp.float32) + b0_ref[...]
    x1 = _row_normalize(s0)

    # ---- layer 1:  (A @ X1) @ W1 + b1, row-L2-normalize --------------------
    side1 = jnp.dot(adj, x1, preferred_element_type=jnp.float32)
    s1 = jnp.dot(side1, w1_ref[...], preferred_element_type=jnp.float32) + b1_ref[...]
    o_ref[...] = _row_normalize(s1).astype(o_ref.dtype)


def dhgcf1_prepare(norm_L, params):
    """One-time preprocessing (hoisted out of the per-call forward path):
    pad weights/biases to lane-dense (multiple-of-128) shapes and cast the
    adjacency.  Returns a dict of device arrays reusable across calls."""
    N = norm_L.shape[0]
    F = params["W_gc_0"].shape[0]
    D = params["W_gc_0"].shape[1]
    assert params["W_gc_1"].shape == (D, F)
    Fp = _round_up(F, _LANE)
    Dp = _round_up(D, _LANE)
    prepared = {
        "adj": jnp.asarray(norm_L, jnp.float32),
        "w0": _pad2d(jnp.asarray(params["W_gc_0"], jnp.float32), Fp, Dp),
        "b0": _pad2d(jnp.asarray(params["b_gc_0"], jnp.float32), 1, Dp),
        "w1": _pad2d(jnp.asarray(params["W_gc_1"], jnp.float32), Dp, Fp),
        "b1": _pad2d(jnp.asarray(params["b_gc_1"], jnp.float32), 1, Fp),
        "N": N,
        "F": F,
        "Fp": Fp,
        "Dp": Dp,
    }
    return prepared


def dhgcf1_forward(fts, prepared):
    """Fused two-layer DHGCF1 forward: s_k = (A X) W_k + b_k, row-L2-norm."""
    N, F, Fp, Dp = prepared["N"], prepared["F"], prepared["Fp"], prepared["Dp"]
    assert fts.shape == (N, F)

    # Only per-call host-side op: lane-pad the feature matrix.
    x = _pad2d(jnp.asarray(fts, jnp.float32), N, Fp)

    vmem_spec = pl.BlockSpec(memory_space=pltpu.MemorySpace.VMEM)
    out_padded = pl.pallas_call(
        _dhgcf1_fused_kernel,
        out_shape=jax.ShapeDtypeStruct((N, Fp), jnp.float32),
        in_specs=[vmem_spec] * 6,
        out_specs=vmem_spec,
    )(prepared["adj"], x, prepared["w0"], prepared["b0"],
      prepared["w1"], prepared["b1"])

    return out_padded[:, :F]


def _xavier_uniform(key, shape):
    fan_in, fan_out = shape[0], shape[1]
    a = jnp.sqrt(6.0 / (fan_in + fan_out))
    return jax.random.uniform(key, shape, jnp.float32, minval=-a, maxval=a)


def _reference(fts, norm_L, params):
    x = fts
    for k in range(2):
        side = jnp.dot(norm_L, x, precision=lax.Precision.HIGHEST)
        s = jnp.dot(side, params["W_gc_%d" % k],
                    precision=lax.Precision.HIGHEST) + params["b_gc_%d" % k]
        nrm = jnp.sqrt(jnp.sum(s * s, axis=1, keepdims=True))
        x = s / jnp.maximum(nrm, 1e-12)
    return x


if __name__ == "__main__":
    # Small deterministic shapes consistent with the module:
    #   N nodes = 64, feature dim (fts.shape[1]) = 32, embed_size = 16
    N, F_DIM, EMB = 64, 32, 16

    key = jax.random.PRNGKey(0)
    k_fts, k_adj, k_w0, k_b0, k_w1, k_b1 = jax.random.split(key, 6)

    fts = jax.random.normal(k_fts, (N, F_DIM), jnp.float32)

    # Deterministic dense "normalized Laplacian"-like adjacency.
    raw = jax.random.uniform(k_adj, (N, N), jnp.float32)
    raw = 0.5 * (raw + raw.T)
    deg = jnp.sum(raw, axis=1, keepdims=True)
    norm_L = raw / jnp.sqrt(deg) / jnp.sqrt(deg.T)

    params = {
        "W_gc_0": _xavier_uniform(k_w0, (F_DIM, EMB)),
        "b_gc_0": _xavier_uniform(k_b0, (1, EMB)),
        "W_gc_1": _xavier_uniform(k_w1, (EMB, F_DIM)),
        "b_gc_1": _xavier_uniform(k_b1, (1, F_DIM)),
    }

    # One-time preparation (padding/casting hoisted out of the hot path).
    prepared = dhgcf1_prepare(norm_L, params)

    out = jax.block_until_ready(dhgcf1_forward(fts, prepared))
    ref = _reference(fts, norm_L, params)

    assert out.shape == (N, F_DIM)
    # f32 MXU matmuls (multi-pass bf16) vs HIGHEST-precision reference:
    max_err = float(jnp.max(jnp.abs(out - ref)))
    assert jnp.allclose(out, ref, atol=2e-3, rtol=2e-3), max_err

    print("KERNEL_OK")
</pallas_src>

<mosaic_0001>
module attributes {stable_mosaic.version = 11 : i64} {
  func.func @_dhgcf1_fused_kernel(%arg0: memref<64x64xf32, #tpu.memory_space<vmem>>, %arg1: memref<64x128xf32, #tpu.memory_space<vmem>>, %arg2: memref<128x128xf32, #tpu.memory_space<vmem>>, %arg3: memref<1x128xf32, #tpu.memory_space<vmem>>, %arg4: memref<128x128xf32, #tpu.memory_space<vmem>>, %arg5: memref<1x128xf32, #tpu.memory_space<vmem>>, %arg6: memref<64x128xf32, #tpu.memory_space<vmem>>) attributes {dimension_semantics = [], scalar_prefetch = 0 : i64, scratch_operands = 0 : i64, tpu.core_type = #tpu.core_type<tc>} {
    %c0 = arith.constant 0 : index
    %c0_0 = arith.constant 0 : index
    %0 = vector.load %arg0[%c0, %c0_0] : memref<64x64xf32, #tpu.memory_space<vmem>>, vector<64x64xf32>
    %c0_1 = arith.constant 0 : index
    %c0_2 = arith.constant 0 : index
    %1 = vector.load %arg1[%c0_1, %c0_2] : memref<64x128xf32, #tpu.memory_space<vmem>>, vector<64x128xf32>
    %c0_3 = arith.constant 0 : index
    %c0_4 = arith.constant 0 : index
    %2 = vector.load %arg2[%c0_3, %c0_4] : memref<128x128xf32, #tpu.memory_space<vmem>>, vector<128x128xf32>
    %cst = arith.constant dense<0.000000e+00> : vector<64x128xf32>
    %3 = tpu.matmul %1, %2, %cst {dimension_numbers = #tpu.dot_dimension_numbers<[1], [0], [0], [1], [0, 0, 1, 1], [], []>} : vector<64x128xf32>, vector<128x128xf32>, vector<64x128xf32> -> vector<64x128xf32>
    %cst_5 = arith.constant dense<0.000000e+00> : vector<64x128xf32>
    %4 = tpu.matmul %0, %3, %cst_5 {dimension_numbers = #tpu.dot_dimension_numbers<[1], [0], [0], [1], [0, 0, 1, 1], [], []>} : vector<64x64xf32>, vector<64x128xf32>, vector<64x128xf32> -> vector<64x128xf32>
    %c0_6 = arith.constant 0 : index
    %c0_7 = arith.constant 0 : index
    %5 = vector.load %arg3[%c0_6, %c0_7] : memref<1x128xf32, #tpu.memory_space<vmem>>, vector<1x128xf32>
    %6 = vector.broadcast %5 : vector<1x128xf32> to vector<64x128xf32>
    %7 = arith.addf %4, %6 : vector<64x128xf32>
    %8 = arith.mulf %7, %7 : vector<64x128xf32>
    %cst_8 = arith.constant dense<0.000000e+00> : vector<64xf32>
    %9 = vector.multi_reduction <add>, %8, %cst_8 [1] : vector<64x128xf32> to vector<64xf32>
    %10 = vector.shape_cast %9 : vector<64xf32> to vector<64x1xf32>
    %cst_9 = arith.constant 1.000000e-24 : f32
    %11 = vector.broadcast %cst_9 : f32 to vector<64x1xf32>
    %12 = arith.maximumf %10, %11 : vector<64x1xf32>
    %13 = math.rsqrt %12 : vector<64x1xf32>
    %14 = vector.broadcast %13 : vector<64x1xf32> to vector<64x128xf32>
    %15 = arith.mulf %7, %14 : vector<64x128xf32>
    %cst_10 = arith.constant dense<0.000000e+00> : vector<64x128xf32>
    %16 = tpu.matmul %0, %15, %cst_10 {dimension_numbers = #tpu.dot_dimension_numbers<[1], [0], [0], [1], [0, 0, 1, 1], [], []>} : vector<64x64xf32>, vector<64x128xf32>, vector<64x128xf32> -> vector<64x128xf32>
    %c0_11 = arith.constant 0 : index
    %c0_12 = arith.constant 0 : index
    %17 = vector.load %arg4[%c0_11, %c0_12] : memref<128x128xf32, #tpu.memory_space<vmem>>, vector<128x128xf32>
    %cst_13 = arith.constant dense<0.000000e+00> : vector<64x128xf32>
    %18 = tpu.matmul %16, %17, %cst_13 {dimension_numbers = #tpu.dot_dimension_numbers<[1], [0], [0], [1], [0, 0, 1, 1], [], []>} : vector<64x128xf32>, vector<128x128xf32>, vector<64x128xf32> -> vector<64x128xf32>
    %c0_14 = arith.constant 0 : index
    %c0_15 = arith.constant 0 : index
    %19 = vector.load %arg5[%c0_14, %c0_15] : memref<1x128xf32, #tpu.memory_space<vmem>>, vector<1x128xf32>
    %20 = vector.broadcast %19 : vector<1x128xf32> to vector<64x128xf32>
    %21 = arith.addf %18, %20 : vector<64x128xf32>
    %22 = arith.mulf %21, %21 : vector<64x128xf32>
    %cst_16 = arith.constant dense<0.000000e+00> : vector<64xf32>
    %23 = vector.multi_reduction <add>, %22, %cst_16 [1] : vector<64x128xf32> to vector<64xf32>
    %24 = vector.shape_cast %23 : vector<64xf32> to vector<64x1xf32>
    %cst_17 = arith.constant 1.000000e-24 : f32
    %25 = vector.broadcast %cst_17 : f32 to vector<64x1xf32>
    %26 = arith.maximumf %24, %25 : vector<64x1xf32>
    %27 = math.rsqrt %26 : vector<64x1xf32>
    %28 = vector.broadcast %27 : vector<64x1xf32> to vector<64x128xf32>
    %29 = arith.mulf %21, %28 : vector<64x128xf32>
    %c0_18 = arith.constant 0 : index
    %c0_19 = arith.constant 0 : index
    %30 = vector.load %arg6[%c0_18, %c0_19] : memref<64x128xf32, #tpu.memory_space<vmem>>, vector<64x128xf32>
    tpu.vector_store %arg6[%c0_18, %c0_19], %29 {strides = array<i32>} : memref<64x128xf32, #tpu.memory_space<vmem>>, vector<64x128xf32>,
    return
  }
}

</mosaic_0001>

<bundles_post_ra>
// kernel: tpu_custom_call.1
= control target key start
LH: loop header
LB: loop body
LE: loop exit
PB: predicated region body
PF: predicated region fallthrough
CT: control target
= control target key end

     0   :  { %11 = vsyncpa [#allocation3], 0  ;;  %s1066_s0 = inlined_call_operand.hbm [shape: f32[64,64], index: 0, kind: input, shape index: {}]   ;;  %s1067_s1 = inlined_call_operand.hbm [shape: f32[64,128], index: 1, kind: input, shape index: {}]   ;;  %s1068_s2 = inlined_call_operand.hbm [shape: f32[128,128], index: 2, kind: input, shape index: {}]   ;;  %s1069_s3 = inlined_call_operand.vmem [shape: f32[1,128], index: 3, kind: input, shape index: {}]   ;;  %s1070_s4 = inlined_call_operand.hbm [shape: f32[128,128], index: 4, kind: input, shape index: {}]   ;;  %s1071_s5 = inlined_call_operand.vmem [shape: f32[1,128], index: 5, kind: input, shape index: {}]   ;;  %s1072_s6 = inlined_call_operand.hbm [shape: f32[64,128], index: 6, kind: output, shape index: {}]  }
   0x1   :  { %12 = vsyncpa [#allocation6], 0 }
   0x2   :  { %13 = vsyncpa [#allocation9], 0 }
   0x3   :  { %14 = vsyncpa [#allocation4], 0  ;;  %s32_s23 = sshll.u32 %s1067_s1, 4  ;;  %s786_s24 = smov [#allocation5]   ;;  %s33_s23 = int_to_ptr.hbm [resolvable:$true] %s32_s23 }
   0x4   :  { %s34_s25 = sshll.u32 %s786_s24, 4  ;;  %s19_s28 = sshll.u32 %s1066_s0, 4  ;;  %s35_s25 = int_to_ptr.vmem [resolvable:$true] %s34_s25  ;;  %s20_s28 = int_to_ptr.hbm [resolvable:$true] %s19_s28 }
   0x5   :  { %s787_s29 = smov 128   ;;  %s788_s30 = smov 8  }
   0x6   :  { %40 = dma.hbm_to_vmem [thread:$0]  %s33_s23, 1024, %s35_s25, [#allocation6], %s787_s29, %s787_s29, %s788_s30  }
   0x7   :  { %s789_s7 = smov [#allocation2]   ;;  %s45_s1 = sshll.u32 %s1068_s2, 4  ;;  %s46_s1 = int_to_ptr.hbm [resolvable:$true] %s45_s1 }
   0x8   :  { %s21_s8 = sshll.u32 %s789_s7, 4  ;;  %s60_s12 = sshll.u32 %s1070_s4, 4  ;;  %s22_s8 = int_to_ptr.vmem [resolvable:$true] %s21_s8  ;;  %s61_s12 = int_to_ptr.hbm [resolvable:$true] %s60_s12 }
   0x9   :  { %27 = dma.hbm_to_vmem [thread:$0]  %s20_s28, 1024, %s22_s8, [#allocation3], %s787_s29, %s787_s29, %s788_s30  }
   0xa   :  { %s790_s13 = smov [#allocation7]   ;;  %s791_s15 = smov [#allocation8]  }
   0xb   :  { %s47_s14 = sshll.u32 %s790_s13, 4  ;;  %s62_s2 = sshll.u32 %s791_s15, 4  ;;  %s48_s14 = int_to_ptr.vmem [resolvable:$true] %s47_s14  ;;  %s63_s2 = int_to_ptr.vmem [resolvable:$true] %s62_s2 }
   0xc   :  { %53 = dma.hbm_to_vmem [thread:$0]  %s46_s1, 2048, %s48_s14, [#allocation6], %s787_s29, %s787_s29, %s788_s30  }
   0xd   :  { %68 = dma.hbm_to_vmem [thread:$0]  %s61_s12, 2048, %s63_s2, [#allocation9], %s787_s29, %s787_s29, %s788_s30  }
   0xe   :  { %778 = dma.done.wait [#allocation3], 1024  }
   0xf   :  { %779 = vsyncadd [#allocation3], 4294966272 }
  0x10   :  { %780 = dma.done.wait [#allocation6], 3072  }
  0x11   :  { %781 = vsyncadd [#allocation6], 4294964224 }
  0x12   :  { %782 = dma.done.wait [#allocation9], 2048  }
  0x13   :  { %783 = vsyncadd [#allocation9], 4294965248  ;;  %v118_v0 = vld [vmem:[#allocation7 + $0x78] sm:$0xff]  ;;  %v117_v1 = vld [vmem:[#allocation7 + $0x70] sm:$0xff]  ;;  %vm164_vm0 = vcmask 523264   ;;  %s586_s21 = sshll.u32 %s1072_s6, 4  ;;  %s587_s21 = int_to_ptr.hbm [resolvable:$true] %s586_s21 }
  0x14   :  { %119 = vmatpush.msra.mxu0 %v118_v0  ;;  %v116_v2 = vld [vmem:[#allocation7 + $0x68] sm:$0xff]  ;;  %v115_v3 = vld [vmem:[#allocation7 + $0x60] sm:$0xff]  ;;  %v114_v4 = vld [vmem:[#allocation7 + $0x58] sm:$0xff] }
  0x15   :  { %v113_v5 = vld [vmem:[#allocation7 + $0x50] sm:$0xff]  ;;  %v112_v6 = vld [vmem:[#allocation7 + $0x48] sm:$0xff]  ;;  %v111_v7 = vld [vmem:[#allocation7 + $0x40] sm:$0xff] }
  0x16   :  { %120 = vmatpush.msra.mxu0 %v117_v1  ;;  %v110_v8 = vld [vmem:[#allocation7 + $0x38] sm:$0xff]  ;;  %v109_v9 = vld [vmem:[#allocation7 + $0x30] sm:$0xff]  ;;  %v108_v10 = vld [vmem:[#allocation7 + $0x28] sm:$0xff] }
  0x17   :  { %v107_v11 = vld [vmem:[#allocation7 + $0x20] sm:$0xff]  ;;  %v106_v12 = vld [vmem:[#allocation7 + $0x18] sm:$0xff]  ;;  %v105_v13 = vld [vmem:[#allocation7 + $0x10] sm:$0xff] }
  0x18   :  { %121 = vmatpush.msra.mxu0 %v116_v2  ;;  %v104_v14 = vld [vmem:[#allocation7 + $0x8] sm:$0xff]  ;;  %v103_v15 = vld [vmem:[#allocation7] sm:$0xff]  ;;  %v97_v18 = vld [vmem:[#allocation5 + $0x10] sm:$0xff] }
  0x19   :  { %v95_v16 = vld [vmem:[#allocation5] sm:$0xff]  ;;  %v96_v17 = vld [vmem:[#allocation5 + $0x8] sm:$0xff]  ;;  %v98_v19 = vld [vmem:[#allocation5 + $0x18] sm:$0xff] }
  0x1a   :  { %122 = vmatpush.msra.mxu0 %v115_v3  ;;  %v99_v20 = vld [vmem:[#allocation5 + $0x20] sm:$0xff]  ;;  %v100_v21 = vld [vmem:[#allocation5 + $0x28] sm:$0xff]  ;;  %v101_v22 = vld [vmem:[#allocation5 + $0x30] sm:$0xff] }
  0x1b   :  { %v102_v23 = vld [vmem:[#allocation5 + $0x38] sm:$0xff]  ;;  %v852_v32 = vld [vmem:[#allocation2] sm:$0xff]  ;;  %v856_v33 = vld [vmem:[#allocation2 + $0x8] sm:$0xff] }
  0x1c   :  { %123 = vmatpush.msra.mxu0 %v114_v4  ;;  %v860_v34 = vld [vmem:[#allocation2 + $0x10] sm:$0xff]  ;;  %v864_v35 = vld [vmem:[#allocation2 + $0x18] sm:$0xff]  ;;  %v868_v36 = vld [vmem:[#allocation2 + $0x20] sm:$0xff] }
  0x1d   :  { %v872_v37 = vld [vmem:[#allocation2 + $0x28] sm:$0xff]  ;;  %v876_v38 = vld [vmem:[#allocation2 + $0x30] sm:$0xff]  ;;  %v880_v39 = vld [vmem:[#allocation2 + $0x38] sm:$0xff] }
  0x1e   :  { %124 = vmatpush.msra.mxu0 %v113_v5  ;;  %v624_v43 = vld [vmem:[%s1069_s3] ss:$0 sm:$0xff] }
  0x20   :  { %125 = vmatpush.msra.mxu0 %v112_v6 }
  0x22   :  { %126 = vmatpush.msra.mxu0 %v111_v7 }
  0x24   :  { %127 = vmatpush.msra.mxu0 %v110_v8 }
  0x26   :  { %128 = vmatpush.msra.mxu0 %v109_v9 }
  0x28   :  { %129 = vmatpush.msra.mxu0 %v108_v10 }
  0x2a   :  { %130 = vmatpush.msra.mxu0 %v107_v11 }
  0x2c   :  { %131 = vmatpush.msra.mxu0 %v106_v12 }
  0x2e   :  { %132 = vmatpush.msra.mxu0 %v105_v13 }
  0x30   :  { %133 = vmatpush.msra.mxu0 %v104_v14 }
  0x32   :  { %134 = vmatpush.msra.mxu0 %v103_v15 }
  0x33   :  { %135 = vmatmul.f32.vlgmr.msra.gmra.mxu0 %v95_v16 }
  0x3b   :  { %138 = vmatmul.f32.gmra.mxu0 %v96_v17 }
  0x43   :  { %141 = vmatmul.f32.gmra.mxu0 %v97_v18 }
  0x4b   :  { %144 = vmatmul.f32.gmra.mxu0 %v98_v19 }
  0x53   :  { %147 = vmatmul.f32.gmra.mxu0 %v99_v20 }
  0x5b   :  { %150 = vmatmul.f32.gmra.mxu0 %v100_v21 }
  0x63   :  { %153 = vmatmul.f32.gmra.mxu0 %v101_v22 }
  0x6b   :  { %156 = vmatmul.f32.gmra.mxu0 %v102_v23 }
  0xb0   :  { %v136_v24 = vpop.f32.mrf.mxu0 }
  0xb8   :  { %v139_v25 = vpop.f32.mrf.mxu0 }
  0xc0   :  { %v142_v26 = vpop.f32.mrf.mxu0 }
  0xc8   :  { %v145_v27 = vpop.f32.mrf.mxu0 }
  0xd0   :  { %v148_v28 = vpop.f32.mrf.mxu0 }
  0xd8   :  { %v151_v29 = vpop.f32.mrf.mxu0 }
  0xe0   :  { %v154_v30 = vpop.f32.mrf.mxu0 }
  0xe8   :  { %v157_v31 = vpop.f32.mrf.mxu0 }
  0xe9   :  { %197 = vmatpush.msra.mxu1 %v157_v31 }
  0xeb   :  { %198 = vmatpush.msra.mxu1 %v154_v30 }
  0xed   :  { %199 = vmatpush.msra.mxu1 %v151_v29 }
  0xef   :  { %200 = vmatpush.msra.mxu1 %v148_v28 }
  0xf1   :  { %201 = vmatpush.msra.mxu1 %v145_v27 }
  0xf3   :  { %202 = vmatpush.msra.mxu1 %v142_v26 }
  0xf5   :  { %203 = vmatpush.msra.mxu1 %v139_v25 }
  0xf7   :  { %204 = vmatpush.msra.mxu1 %v136_v24 }
  0xf8   :  { %601 = vmatmul.msk.f32.vlgmr.msra.gmra.mxu1 %vm164_vm0, %v852_v32 }
 0x100   :  { %602 = vmatmul.msk.f32.gmra.mxu1 %vm164_vm0, %v856_v33 }
 0x108   :  { %603 = vmatmul.msk.f32.gmra.mxu1 %vm164_vm0, %v860_v34 }
 0x110   :  { %604 = vmatmul.msk.f32.gmra.mxu1 %vm164_vm0, %v864_v35 }
 0x118   :  { %605 = vmatmul.msk.f32.gmra.mxu1 %vm164_vm0, %v868_v36 }
 0x120   :  { %606 = vmatmul.msk.f32.gmra.mxu1 %vm164_vm0, %v872_v37 }
 0x128   :  { %607 = vmatmul.msk.f32.gmra.mxu1 %vm164_vm0, %v876_v38 }
 0x130   :  { %608 = vmatmul.msk.f32.gmra.mxu1 %vm164_vm0, %v880_v39 }
 0x175   :  { %v206_v40 = vpop.f32.mrf.mxu1 }
 0x176   :  { %v903_v56 = vadd.f32 %v624_v43, %v206_v40 }
 0x178   :  { %v230_v60 = vmul.f32 %v903_v56, %v903_v56 }
 0x17d   :  { %v209_v41 = vpop.f32.mrf.mxu1 }
 0x17e   :  { %v915_v63 = vadd.f32 %v624_v43, %v209_v41 }
 0x180   :  { %v231_v0 = vmul.f32 %v915_v63, %v915_v63 }
 0x185   :  { %v212_v42 = vpop.f32.mrf.mxu1 }
 0x186   :  { %v891_v47 = vadd.f32 %v624_v43, %v212_v42 }
 0x188   :  { %v232_v49 = vmul.f32 %v891_v47, %v891_v47 }
 0x18d   :  { %v215_v44 = vpop.f32.mrf.mxu1 }
 0x18e   :  { %v887_v45 = vadd.f32 %v624_v43, %v215_v44 }
 0x190   :  { %v233_v46 = vmul.f32 %v887_v45, %v887_v45 }
 0x192   :  { %244 = vadd.xlane.f32.xlu2 %v233_v46 }
 0x195   :  { %v218_v48 = vpop.f32.mrf.mxu1 }
 0x196   :  { %v899_v53 = vadd.f32 %v624_v43, %v218_v48 }
 0x198   :  { %v234_v55 = vmul.f32 %v899_v53, %v899_v53 }
 0x19a   :  { %242 = vadd.xlane.f32.xlu2 %v232_v49 }
 0x19d   :  { %v221_v50 = vpop.f32.mrf.mxu1 }
 0x19e   :  { %v895_v51 = vadd.f32 %v624_v43, %v221_v50 }
 0x1a0   :  { %v235_v52 = vmul.f32 %v895_v51, %v895_v51 }
 0x1a2   :  { %248 = vadd.xlane.f32.xlu1 %v235_v52 }
 0x1a5   :  { %v224_v54 = vpop.f32.mrf.mxu1 }
 0x1a6   :  { %v911_v61 = vadd.f32 %v624_v43, %v224_v54 }
 0x1a8   :  { %v236_v62 = vmul.f32 %v911_v61, %v911_v61 }
 0x1aa   :  { %246 = vadd.xlane.f32.xlu1 %v234_v55 }
 0x1ad   :  { %v227_v57 = vpop.f32.mrf.mxu1 }
 0x1ae   :  { %v905_v58 = vadd.f32 %v624_v43, %v227_v57 }
 0x1b0   :  { %v237_v59 = vmul.f32 %v905_v58, %v905_v58 }
 0x1b2   :  { %252 = vadd.xlane.f32.xlu0 %v237_v59  ;;  %238 = vadd.xlane.f32.xlu1 %v230_v60 }
 0x1ba   :  { %250 = vadd.xlane.f32.xlu0 %v236_v62 }
 0x1c2   :  { %240 = vadd.xlane.f32.xlu0 %v231_v0 }
 0x205   :  { %v245_v2 = vpop.xlane.xlu2 %244 }
 0x206   :  { %v923_v7 = vmax.f32 %v245_v2, 1e-24 }
 0x208   :  { %vm298_vm15 = vweird.f32 %v923_v7 }
 0x20d   :  { %v243_v6 = vpop.xlane.xlu2 %242 }
 0x20e   :  { %v926_v8 = vmax.f32 %v243_v6, 1e-24 }
 0x215   :  { %v249_v1 = vpop.xlane.xlu1 %248 }
 0x216   :  { %v919_v4 = vmax.f32 %v249_v1, 1e-24 }
 0x218   :  { %626 = vrsqrt.f32 %v919_v4  ;;  %vm318_vm6 = vweird.f32 %v919_v4 }
 0x21d   :  { %v247_v3 = vpop.xlane.xlu1 %246 }
 0x21e   :  { %v921_v5 = vmax.f32 %v247_v3, 1e-24  ;;  %v931_v12 = vpop.eup %626 }
 0x21f   :  { %v313_v16 = vmul.f32 %v931_v12, %v919_v4  ;;  %vm319_vm4 = vweird.f32 %v931_v12 }
 0x220   :  { %628 = vrsqrt.f32 %v921_v5  ;;  %vm969_vm9 = vmor %vm318_vm6, %vm319_vm4  ;;  %vm308_vm12 = vweird.f32 %v921_v5 }
 0x221   :  { %630 = vrsqrt.f32 %v923_v7  ;;  %v314_v24 = vmul.f32 %v931_v12, %v313_v16 }
 0x223   :  { %v315_v31 = vmul.f32 0.5, %v314_v24 }
 0x225   :  { %v253_v9 = vpop.xlane.xlu0 %252  ;;  %v239_v11 = vpop.xlane.xlu1 %238  ;;  %v316_v54 = vsub.f32 1.5, %v315_v31 }
 0x226   :  { %v261_v10 = vmax.f32 %v253_v9, 1e-24  ;;  %v933_v13 = vmax.f32 %v239_v11, 1e-24  ;;  %v935_v14 = vpop.eup %628 }
 0x227   :  { %v937_v15 = vpop.eup %630  ;;  %v303_v19 = vmul.f32 %v935_v14, %v921_v5  ;;  %v317_v6 = vmul.f32 %v931_v12, %v316_v54  ;;  %vm309_vm7 = vweird.f32 %v935_v14 }
 0x228   :  { %632 = vrsqrt.f32 %v261_v10  ;;  %v293_v23 = vmul.f32 %v937_v15, %v923_v7  ;;  %vm338_vm2 = vweird.f32 %v261_v10  ;;  %vm299_vm11 = vweird.f32 %v937_v15  ;;  %vm980_vm13 = vmor %vm308_vm12, %vm309_vm7 }
 0x229   :  { %634 = vrsqrt.f32 %v926_v8  ;;  %v304_v27 = vmul.f32 %v935_v14, %v303_v19 }
 0x22a   :  { %636 = vrsqrt.f32 %v933_v13  ;;  %v294_v30 = vmul.f32 %v937_v15, %v293_v23 }
 0x22b   :  { %v305_v44 = vmul.f32 0.5, %v304_v27 }
 0x22c   :  { %v295_v52 = vmul.f32 0.5, %v294_v30 }
 0x22d   :  { %v251_v17 = vpop.xlane.xlu0 %250  ;;  %v306_v60 = vsub.f32 1.5, %v305_v44  ;;  %v392_v44 = vld [vmem:[#allocation8 + $0x8] sm:$0xff] }
 0x22e   :  { %v633_v18 = vpop.eup %632  ;;  %v260_v20 = vmax.f32 %v251_v17, 1e-24  ;;  %v296_v2 = vsub.f32 1.5, %v295_v52 }
 0x22f   :  { %v944_v21 = vpop.eup %634  ;;  %v333_v22 = vmul.f32 %v633_v18, %v261_v10  ;;  %vm339_vm1 = vweird.f32 %v633_v18  ;;  %v307_v11 = vmul.f32 %v935_v14, %v306_v60 }
 0x230   :  { %638 = vrsqrt.f32 %v260_v20  ;;  %v283_v26 = vmul.f32 %v944_v21, %v926_v8  ;;  %v952_v29 = vpop.eup %636  ;;  %vm340_vm3 = vmor %vm338_vm2, %vm339_vm1  ;;  %vm328_vm8 = vweird.f32 %v260_v20  ;;  %v297_v19 = vmul.f32 %v937_v15, %v296_v2 }
 0x231   :  { %v334_v25 = vmul.f32 %v633_v18, %v333_v22  ;;  %v263_v48 = vmul.f32 %v952_v29, %v933_v13  ;;  %vm289_vm14 = vweird.f32 %v944_v21  ;;  %v311_v27 = vsel %vm980_vm13, %v935_v14, %v307_v11  ;;  %vm300_vm2 = vmor %vm298_vm15, %vm299_vm11 }
 0x232   :  { %v284_v43 = vmul.f32 %v944_v21, %v283_v26  ;;  %vm288_vm1 = vweird.f32 %v926_v8  ;;  %v346_v7 = vmul.f32 %v311_v27, %v899_v53  ;;  %vm269_vm6 = vweird.f32 %v952_v29 }
 0x233   :  { %v335_v28 = vmul.f32 0.5, %v334_v25  ;;  %v264_v0 = vmul.f32 %v952_v29, %v263_v48 }
 0x234   :  { %v285_v59 = vmul.f32 0.5, %v284_v43  ;;  %v394_v43 = vld [vmem:[#allocation8 + $0x18] sm:$0xff] }
 0x235   :  { %v241_v40 = vpop.xlane.xlu0 %240  ;;  %v336_v41 = vsub.f32 1.5, %v335_v28  ;;  %v301_v28 = vsel %vm300_vm2, %v937_v15, %v297_v19 }
 0x236   :  { %v639_v42 = vpop.eup %638  ;;  %v956_v46 = vmax.f32 %v241_v40, 1e-24  ;;  %v286_v10 = vsub.f32 1.5, %v285_v59 }
 0x237   :  { %v323_v49 = vmul.f32 %v639_v42, %v260_v20  ;;  %v337_v50 = vmul.f32 %v633_v18, %v336_v41  ;;  %vm329_vm5 = vweird.f32 %v639_v42  ;;  %v321_v20 = vsel %vm969_vm9, %v931_v12, %v317_v6  ;;  %v396_v41 = vld [vmem:[#allocation8 + $0x28] sm:$0xff] }
 0x238   :  { %640 = vrsqrt.f32 %v956_v46  ;;  %vm330_vm10 = vmor %vm328_vm8, %vm329_vm5  ;;  %v287_v25 = vmul.f32 %v944_v21, %v286_v10  ;;  %vm278_vm5 = vweird.f32 %v956_v46  ;;  %vm268_vm8 = vweird.f32 %v933_v13  ;;  %v403_v13 = vld [vmem:[#allocation8 + $0x60] sm:$0xff] }
 0x239   :  { %v324_v55 = vmul.f32 %v639_v42, %v323_v49  ;;  %v341_v57 = vsel %vm340_vm3, %v633_v18, %v337_v50  ;;  %vm290_vm3 = vmor %vm288_vm1, %vm289_vm14 }
 0x23a   :  { %v349_v62 = vmul.f32 %v341_v57, %v905_v58  ;;  %v265_v58 = vmul.f32 0.5, %v264_v0  ;;  %v291_v30 = vsel %vm290_vm3, %v944_v21, %v287_v25  ;;  %vm270_vm9 = vmor %vm268_vm8, %vm269_vm6 }
 0x23b   :  { %v325_v1 = vmul.f32 0.5, %v324_v55  ;;  %v344_v31 = vmul.f32 %v291_v30, %v891_v47  ;;  %v405_v47 = vld [vmem:[#allocation8 + $0x70] sm:$0xff] }
 0x23c   :  { %358 = vmatpush.msra.mxu2 %v349_v62  ;;  %v266_v26 = vsub.f32 1.5, %v265_v58 }
 0x23d   :  { %v326_v3 = vsub.f32 1.5, %v325_v1 }
 0x23e   :  { %v641_v9 = vpop.eup %640  ;;  %v267_v8 = vmul.f32 %v952_v29, %v266_v26 }
 0x23f   :  { %v273_v16 = vmul.f32 %v641_v9, %v956_v46  ;;  %v327_v17 = vmul.f32 %v639_v42, %v326_v3  ;;  %vm279_vm4 = vweird.f32 %v641_v9 }
 0x240   :  { %vm280_vm7 = vmor %vm278_vm5, %vm279_vm4  ;;  %v271_v53 = vsel %vm270_vm9, %v952_v29, %v267_v8  ;;  %v398_v29 = vld [vmem:[#allocation8 + $0x38] sm:$0xff] }
 0x241   :  { %v274_v4 = vmul.f32 %v641_v9, %v273_v16  ;;  %v331_v22 = vsel %vm330_vm10, %v639_v42, %v327_v17  ;;  %v342_v40 = vmul.f32 %v271_v53, %v903_v56  ;;  %v402_v56 = vld [vmem:[#allocation8 + $0x58] sm:$0xff]  ;;  %v395_v42 = vld [vmem:[#allocation8 + $0x20] sm:$0xff] }
 0x242   :  { %v348_v23 = vmul.f32 %v331_v22, %v911_v61  ;;  %v347_v61 = vmul.f32 %v321_v20, %v895_v51  ;;  %v345_v51 = vmul.f32 %v301_v28, %v887_v45  ;;  %v406_v45 = vld [vmem:[#allocation8 + $0x78] sm:$0xff] }
 0x243   :  { %v275_v5 = vmul.f32 0.5, %v274_v4  ;;  %411 = vmatpush.msra.mxu3 %v406_v45 }
 0x244   :  { %359 = vmatpush.msra.mxu2 %v348_v23 }
 0x245   :  { %v276_v12 = vsub.f32 1.5, %v275_v5  ;;  %412 = vmatpush.msra.mxu3 %v405_v47 }
 0x246   :  { %360 = vmatpush.msra.mxu2 %v347_v61 }
 0x247   :  { %v277_v14 = vmul.f32 %v641_v9, %v276_v12 }
 0x248   :  { %361 = vmatpush.msra.mxu2 %v346_v7 }
 0x249   :  { %v281_v15 = vsel %vm280_vm7, %v641_v9, %v277_v14 }
 0x24a   :  { %362 = vmatpush.msra.mxu2 %v345_v51  ;;  %v343_v21 = vmul.f32 %v281_v15, %v915_v63  ;;  %v404_v63 = vld [vmem:[#allocation8 + $0x68] sm:$0xff] }
 0x24b   :  { %413 = vmatpush.msra.mxu3 %v404_v63 }
 0x24c   :  { %363 = vmatpush.msra.mxu2 %v344_v31 }
 0x24d   :  { %414 = vmatpush.msra.mxu3 %v403_v13 }
 0x24e   :  { %364 = vmatpush.msra.mxu2 %v343_v21 }
 0x24f   :  { %415 = vmatpush.msra.mxu3 %v402_v56 }
 0x250   :  { %365 = vmatpush.msra.mxu2 %v342_v40 }
 0x251   :  { %609 = vmatmul.msk.f32.vlgmr.msra.gmra.mxu2 %vm164_vm0, %v852_v32  ;;  %v401_v32 = vld [vmem:[#allocation8 + $0x50] sm:$0xff] }
 0x252   :  { %416 = vmatpush.msra.mxu3 %v401_v32 }
 0x259   :  { %610 = vmatmul.msk.f32.gmra.mxu2 %vm164_vm0, %v856_v33  ;;  %v400_v33 = vld [vmem:[#allocation8 + $0x48] sm:$0xff] }
 0x25a   :  { %417 = vmatpush.msra.mxu3 %v400_v33 }
 0x261   :  { %611 = vmatmul.msk.f32.gmra.mxu2 %vm164_vm0, %v860_v34  ;;  %v399_v34 = vld [vmem:[#allocation8 + $0x40] sm:$0xff] }
 0x262   :  { %418 = vmatpush.msra.mxu3 %v399_v34 }
 0x264   :  { %419 = vmatpush.msra.mxu3 %v398_v29 }
 0x269   :  { %612 = vmatmul.msk.f32.gmra.mxu2 %vm164_vm0, %v864_v35  ;;  %v397_v35 = vld [vmem:[#allocation8 + $0x30] sm:$0xff] }
 0x26a   :  { %420 = vmatpush.msra.mxu3 %v397_v35 }
 0x26c   :  { %421 = vmatpush.msra.mxu3 %v396_v41 }
 0x26e   :  { %422 = vmatpush.msra.mxu3 %v395_v42 }
 0x270   :  { %423 = vmatpush.msra.mxu3 %v394_v43 }
 0x271   :  { %613 = vmatmul.msk.f32.gmra.mxu2 %vm164_vm0, %v868_v36  ;;  %v393_v36 = vld [vmem:[#allocation8 + $0x10] sm:$0xff] }
 0x272   :  { %424 = vmatpush.msra.mxu3 %v393_v36 }
 0x274   :  { %425 = vmatpush.msra.mxu3 %v392_v44 }
 0x279   :  { %614 = vmatmul.msk.f32.gmra.mxu2 %vm164_vm0, %v872_v37  ;;  %v391_v37 = vld [vmem:[#allocation8] sm:$0xff] }
 0x27a   :  { %426 = vmatpush.msra.mxu3 %v391_v37 }
 0x281   :  { %615 = vmatmul.msk.f32.gmra.mxu2 %vm164_vm0, %v876_v38 }
 0x289   :  { %616 = vmatmul.msk.f32.gmra.mxu2 %vm164_vm0, %v880_v39  ;;  %v625_v39 = vld [vmem:[%s1071_s5] ss:$0 sm:$0xff]  ;;  %s792_s5 = smov [#allocation10]  }
 0x28a   :  { %s584_s18 = sshll.u32 %s792_s5, 4  ;;  %s585_s18 = int_to_ptr.vmem [resolvable:$true] %s584_s18 }
 0x2d4   :  { %v367_v46 = vpop.f32.mrf.mxu2 }
 0x2d5   :  { %427 = vmatmul.f32.vlgmr.msra.gmra.mxu3 %v367_v46 }
 0x2dc   :  { %v370_v48 = vpop.f32.mrf.mxu2 }
 0x2dd   :  { %430 = vmatmul.f32.gmra.mxu3 %v370_v48 }
 0x2e4   :  { %v373_v49 = vpop.f32.mrf.mxu2 }
 0x2e5   :  { %433 = vmatmul.f32.gmra.mxu3 %v373_v49 }
 0x2ec   :  { %v376_v50 = vpop.f32.mrf.mxu2 }
 0x2ed   :  { %436 = vmatmul.f32.gmra.mxu3 %v376_v50 }
 0x2f4   :  { %v379_v52 = vpop.f32.mrf.mxu2 }
 0x2f5   :  { %439 = vmatmul.f32.gmra.mxu3 %v379_v52 }
 0x2fc   :  { %v382_v38 = vpop.f32.mrf.mxu2 }
 0x2fd   :  { %442 = vmatmul.f32.gmra.mxu3 %v382_v38 }
 0x304   :  { %v385_v54 = vpop.f32.mrf.mxu2 }
 0x305   :  { %445 = vmatmul.f32.gmra.mxu3 %v385_v54 }
 0x30c   :  { %v388_v55 = vpop.f32.mrf.mxu2 }
 0x30d   :  { %448 = vmatmul.f32.gmra.mxu3 %v388_v55 }
 0x358   :  { %v428_v57 = vpop.f32.mrf.mxu3 }
 0x359   :  { %v429_v59 = vadd.f32 %v625_v39, %v428_v57 }
 0x35b   :  { %v452_v60 = vmul.f32 %v429_v59, %v429_v59 }
 0x35d   :  { %460 = vadd.xlane.f32.xlu2 %v452_v60 }
 0x360   :  { %v431_v62 = vpop.f32.mrf.mxu3 }
 0x361   :  { %v1025_v0 = vadd.f32 %v625_v39, %v431_v62 }
 0x363   :  { %v453_v1 = vmul.f32 %v1025_v0, %v1025_v0 }
 0x365   :  { %462 = vadd.xlane.f32.xlu0 %v453_v1 }
 0x368   :  { %v434_v2 = vpop.f32.mrf.mxu3 }
 0x369   :  { %v1029_v3 = vadd.f32 %v625_v39, %v434_v2 }
 0x36b   :  { %v454_v6 = vmul.f32 %v1029_v3, %v1029_v3 }
 0x36d   :  { %464 = vadd.xlane.f32.xlu1 %v454_v6 }
 0x370   :  { %v437_v9 = vpop.f32.mrf.mxu3 }
 0x371   :  { %v1033_v10 = vadd.f32 %v625_v39, %v437_v9 }
 0x373   :  { %v455_v11 = vmul.f32 %v1033_v10, %v1033_v10 }
 0x375   :  { %466 = vadd.xlane.f32.xlu2 %v455_v11 }
 0x378   :  { %v440_v58 = vpop.f32.mrf.mxu3 }
 0x379   :  { %v1037_v16 = vadd.f32 %v625_v39, %v440_v58 }
 0x37b   :  { %v456_v17 = vmul.f32 %v1037_v16, %v1037_v16 }
 0x37d   :  { %468 = vadd.xlane.f32.xlu0 %v456_v17 }
 0x380   :  { %v443_v18 = vpop.f32.mrf.mxu3 }
 0x381   :  { %v1041_v19 = vadd.f32 %v625_v39, %v443_v18 }
 0x383   :  { %v457_v4 = vmul.f32 %v1041_v19, %v1041_v19 }
 0x385   :  { %470 = vadd.xlane.f32.xlu1 %v457_v4 }
 0x388   :  { %v446_v22 = vpop.f32.mrf.mxu3 }
 0x389   :  { %v1045_v20 = vadd.f32 %v625_v39, %v446_v22 }
 0x38b   :  { %v458_v23 = vmul.f32 %v1045_v20, %v1045_v20 }
 0x38d   :  { %472 = vadd.xlane.f32.xlu2 %v458_v23 }
 0x390   :  { %v449_v24 = vpop.f32.mrf.mxu3 }
 0x391   :  { %v1049_v25 = vadd.f32 %v625_v39, %v449_v24 }
 0x393   :  { %v459_v26 = vmul.f32 %v1049_v25, %v1049_v25 }
 0x395   :  { %474 = vadd.xlane.f32.xlu0 %v459_v26 }
 0x3d0   :  { %v461_v5 = vpop.xlane.xlu2 %460 }
 0x3d1   :  { %v476_v27 = vmax.f32 %v461_v5, 1e-24 }
 0x3d3   :  { %642 = vrsqrt.f32 %v476_v27  ;;  %vm490_vm10 = vweird.f32 %v476_v27 }
 0x3d8   :  { %v463_v61 = vpop.xlane.xlu0 %462 }
 0x3d9   :  { %v643_v12 = vpop.eup %642  ;;  %v477_v28 = vmax.f32 %v463_v61, 1e-24 }
 0x3da   :  { %v485_v7 = vmul.f32 %v643_v12, %v476_v27  ;;  %vm491_vm0 = vweird.f32 %v643_v12 }
 0x3db   :  { %644 = vrsqrt.f32 %v477_v28  ;;  %vm492_vm11 = vmor %vm490_vm10, %vm491_vm0  ;;  %vm500_vm13 = vweird.f32 %v477_v28 }
 0x3dc   :  { %v486_v30 = vmul.f32 %v643_v12, %v485_v7 }
 0x3de   :  { %v487_v14 = vmul.f32 0.5, %v486_v30 }
 0x3e0   :  { %v488_v8 = vsub.f32 1.5, %v487_v14  ;;  %v465_v51 = vpop.xlane.xlu1 %464 }
 0x3e1   :  { %v645_v15 = vpop.eup %644  ;;  %v478_v31 = vmax.f32 %v465_v51, 1e-24 }
 0x3e2   :  { %v489_v53 = vmul.f32 %v643_v12, %v488_v8  ;;  %v495_v21 = vmul.f32 %v645_v15, %v477_v28  ;;  %vm501_vm12 = vweird.f32 %v645_v15 }
 0x3e3   :  { %646 = vrsqrt.f32 %v478_v31  ;;  %vm502_vm14 = vmor %vm500_vm13, %vm501_vm12  ;;  %vm510_vm1 = vweird.f32 %v478_v31 }
 0x3e4   :  { %v493_v40 = vsel %vm492_vm11, %v643_v12, %v489_v53  ;;  %v496_v45 = vmul.f32 %v645_v15, %v495_v21 }
 0x3e5   :  { %v564_v47 = vmul.f32 %v493_v40, %v429_v59 }
 0x3e6   :  { %v497_v63 = vmul.f32 0.5, %v496_v45 }
 0x3e7   :  { %572 = vst [vmem:[#allocation10] sm:$0xff] %v564_v47 }
 0x3e8   :  { %v498_v13 = vsub.f32 1.5, %v497_v63  ;;  %v467_v56 = vpop.xlane.xlu2 %466 }
 0x3e9   :  { %v647_v32 = vpop.eup %646  ;;  %v479_v33 = vmax.f32 %v467_v56, 1e-24 }
 0x3ea   :  { %v499_v34 = vmul.f32 %v645_v15, %v498_v13  ;;  %v505_v29 = vmul.f32 %v647_v32, %v478_v31  ;;  %vm511_vm15 = vweird.f32 %v647_v32 }
 0x3eb   :  { %648 = vrsqrt.f32 %v479_v33  ;;  %vm512_vm2 = vmor %vm510_vm1, %vm511_vm15  ;;  %vm520_vm4 = vweird.f32 %v479_v33 }
 0x3ec   :  { %v503_v35 = vsel %vm502_vm14, %v645_v15, %v499_v34  ;;  %v506_v41 = vmul.f32 %v647_v32, %v505_v29 }
 0x3ed   :  { %v565_v42 = vmul.f32 %v503_v35, %v1025_v0 }
 0x3ee   :  { %v507_v43 = vmul.f32 0.5, %v506_v41 }
 0x3ef   :  { %573 = vst [vmem:[#allocation10 + $0x8] sm:$0xff] %v565_v42 }
 0x3f0   :  { %v508_v36 = vsub.f32 1.5, %v507_v43  ;;  %v469_v44 = vpop.xlane.xlu0 %468 }
 0x3f1   :  { %v649_v37 = vpop.eup %648  ;;  %v480_v46 = vmax.f32 %v469_v44, 1e-24 }
 0x3f2   :  { %v509_v48 = vmul.f32 %v647_v32, %v508_v36  ;;  %v515_v49 = vmul.f32 %v649_v37, %v479_v33  ;;  %vm521_vm3 = vweird.f32 %v649_v37 }
 0x3f3   :  { %650 = vrsqrt.f32 %v480_v46  ;;  %vm522_vm5 = vmor %vm520_vm4, %vm521_vm3  ;;  %vm530_vm7 = vweird.f32 %v480_v46 }
 0x3f4   :  { %v513_v50 = vsel %vm512_vm2, %v647_v32, %v509_v48  ;;  %v516_v52 = vmul.f32 %v649_v37, %v515_v49 }
 0x3f5   :  { %v566_v38 = vmul.f32 %v513_v50, %v1029_v3 }
 0x3f6   :  { %v517_v54 = vmul.f32 0.5, %v516_v52 }
 0x3f7   :  { %574 = vst [vmem:[#allocation10 + $0x10] sm:$0xff] %v566_v38 }
 0x3f8   :  { %v518_v55 = vsub.f32 1.5, %v517_v54  ;;  %v471_v39 = vpop.xlane.xlu1 %470 }
 0x3f9   :  { %v651_v57 = vpop.eup %650  ;;  %v481_v59 = vmax.f32 %v471_v39, 1e-24 }
 0x3fa   :  { %v519_v60 = vmul.f32 %v649_v37, %v518_v55  ;;  %v525_v62 = vmul.f32 %v651_v57, %v480_v46  ;;  %vm531_vm6 = vweird.f32 %v651_v57 }
 0x3fb   :  { %652 = vrsqrt.f32 %v481_v59  ;;  %vm532_vm8 = vmor %vm530_vm7, %vm531_vm6  ;;  %vm540_vm0 = vweird.f32 %v481_v59 }
 0x3fc   :  { %v523_v0 = vsel %vm522_vm5, %v649_v37, %v519_v60  ;;  %v526_v1 = vmul.f32 %v651_v57, %v525_v62 }
 0x3fd   :  { %v567_v2 = vmul.f32 %v523_v0, %v1033_v10 }
 0x3fe   :  { %v527_v6 = vmul.f32 0.5, %v526_v1 }
 0x3ff   :  { %575 = vst [vmem:[#allocation10 + $0x18] sm:$0xff] %v567_v2 }
 0x400   :  { %v528_v9 = vsub.f32 1.5, %v527_v6  ;;  %v473_v3 = vpop.xlane.xlu2 %472 }
 0x401   :  { %v653_v11 = vpop.eup %652  ;;  %v482_v58 = vmax.f32 %v473_v3, 1e-24 }
 0x402   :  { %v529_v17 = vmul.f32 %v651_v57, %v528_v9  ;;  %v535_v18 = vmul.f32 %v653_v11, %v481_v59  ;;  %vm541_vm9 = vweird.f32 %v653_v11 }
 0x403   :  { %654 = vrsqrt.f32 %v482_v58  ;;  %vm542_vm10 = vmor %vm540_vm0, %vm541_vm9  ;;  %vm550_vm12 = vweird.f32 %v482_v58 }
 0x404   :  { %v533_v4 = vsel %vm532_vm8, %v651_v57, %v529_v17  ;;  %v536_v22 = vmul.f32 %v653_v11, %v535_v18 }
 0x405   :  { %v568_v23 = vmul.f32 %v533_v4, %v1037_v16 }
 0x406   :  { %v537_v24 = vmul.f32 0.5, %v536_v22 }
 0x407   :  { %576 = vst [vmem:[#allocation10 + $0x20] sm:$0xff] %v568_v23 }
 0x408   :  { %v538_v26 = vsub.f32 1.5, %v537_v24  ;;  %v475_v10 = vpop.xlane.xlu0 %474 }
 0x409   :  { %v655_v5 = vpop.eup %654  ;;  %v483_v27 = vmax.f32 %v475_v10, 1e-24 }
 0x40a   :  { %v539_v61 = vmul.f32 %v653_v11, %v538_v26  ;;  %v545_v12 = vmul.f32 %v655_v5, %v482_v58  ;;  %vm551_vm11 = vweird.f32 %v655_v5 }
 0x40b   :  { %656 = vrsqrt.f32 %v483_v27  ;;  %vm552_vm13 = vmor %vm550_vm12, %vm551_vm11  ;;  %vm560_vm15 = vweird.f32 %v483_v27 }
 0x40c   :  { %v543_v28 = vsel %vm542_vm10, %v653_v11, %v539_v61  ;;  %v546_v7 = vmul.f32 %v655_v5, %v545_v12 }
 0x40d   :  { %v569_v30 = vmul.f32 %v543_v28, %v1041_v19 }
 0x40e   :  { %v547_v14 = vmul.f32 0.5, %v546_v7 }
 0x40f   :  { %577 = vst [vmem:[#allocation10 + $0x28] sm:$0xff] %v569_v30 }
 0x410   :  { %v548_v8 = vsub.f32 1.5, %v547_v14 }
 0x411   :  { %v657_v16 = vpop.eup %656 }
 0x412   :  { %v549_v51 = vmul.f32 %v655_v5, %v548_v8  ;;  %v555_v15 = vmul.f32 %v657_v16, %v483_v27  ;;  %vm561_vm14 = vweird.f32 %v657_v16 }
 0x413   :  { %vm562_vm1 = vmor %vm560_vm15, %vm561_vm14 }
 0x414   :  { %v553_v31 = vsel %vm552_vm13, %v655_v5, %v549_v51  ;;  %v556_v53 = vmul.f32 %v657_v16, %v555_v15 }
 0x415   :  { %v570_v21 = vmul.f32 %v553_v31, %v1045_v20 }
 0x416   :  { %v557_v40 = vmul.f32 0.5, %v556_v53 }
 0x417   :  { %578 = vst [vmem:[#allocation10 + $0x30] sm:$0xff] %v570_v21 }
 0x418   :  { %v558_v45 = vsub.f32 1.5, %v557_v40 }
 0x41a   :  { %v559_v47 = vmul.f32 %v657_v16, %v558_v45 }
 0x41c   :  { %v563_v19 = vsel %vm562_vm1, %v657_v16, %v559_v47 }
 0x41d   :  { %v571_v63 = vmul.f32 %v563_v19, %v1049_v25 }
 0x41f   :  { %579 = vst [vmem:[#allocation10 + $0x38] sm:$0xff] %v571_v63 }
 0x420   :  { %592 = dma.vmem_to_hbm [thread:$0]  %s585_s18, 1024, %s587_s21, [#allocation4], %s787_s29, %s787_s29, %s788_s30  }
 0x421   :  { %784 = dma.done.wait [#allocation4], 1024  }
 0x422   :  { %785 = vsyncadd [#allocation4], 4294966272 }
 0x423   :  { %597 = vsyncpa [#allocation3], 1 }
 0x424   :  { %598 = vsyncpa [#allocation6], 1 }
 0x425   :  { %599 = vsyncpa [#allocation9], 1 }
 0x426   :  { %600 = vsyncpa [#allocation4], 1 }

</bundles_post_ra>
